<compile_context>
chip_gen: v7x
topology: tpu7x:2x2x1
jax: 0.10.0
libtpu: 0.0.40
codegen_flags: <defaults>
</compile_context>

<pallas_src>
import functools

import jax
import jax.numpy as jnp
from jax import lax
from jax.experimental import pallas as pl
from jax.experimental.pallas import tpu as pltpu

EPS = 1e-5


def _vmem_limit_bytes():
    # Generation-aware scoped-VMEM limit: ~3/4 of physical (96 MiB on
    # v5e/v6e's 128 MiB, 48 MiB on v7x's 64 MiB); safe fallback if the query
    # is unavailable.
    try:
        cap = pltpu.get_tpu_info().vmem_capacity_bytes
    except Exception:
        cap = 64 * 1024 * 1024
    return int(min(max(cap * 3 // 4, 32 * 1024 * 1024), cap, 128 * 1024 * 1024))


def _pick_hw_tile(hw):
    # Largest lane-dense tile of the flattened H*W axis that leaves >= 2 grid
    # steps (pipeline overlap); whole extent otherwise.
    for cand in (4096, 2048, 1024, 512, 256, 128):
        if hw % cand == 0 and hw // cand >= 2:
            return cand
    return hw


# ----------------------------------------------------------------------------
# Shared in-kernel depthwise 3x3 conv (stride 1, pad 1), channel-major flat.
# ----------------------------------------------------------------------------
def _depthwise_flat(x, kdw_ref, masks_ref, W):
    # x        : (C, H*W) f32, channels on sublanes, pixels lane-dense
    # kdw_ref  : (C, 9)    taps, column t = (dy+1)*3 + (dx+1)
    # masks_ref: (9, H*W)  f32 0/1 validity masks (edge + row-wrap of the roll)
    # Neighbour pixels are fetched with pltpu.roll (XLU slot, no copy-based
    # concatenate shifts); invalid wrapped pixels are zeroed by the masks.
    C, HW = x.shape
    acc = None
    for dy in (-1, 0, 1):
        for dx in (-1, 0, 1):
            t = (dy + 1) * 3 + (dx + 1)
            tap = kdw_ref[:, t:t + 1]                     # (C, 1) lane broadcast
            if dy == 0 and dx == 0:
                term = x * tap
            else:
                shift = (-(dy * W + dx)) % HW             # nbr[p] = x[p + dy*W + dx]
                nbr = pltpu.roll(x, shift, axis=1)
                term = nbr * masks_ref[t:t + 1, :] * tap  # (1,HW) sublane bcast
            acc = term if acc is None else acc + term     # first tap inits acc
    return acc                                            # (C, HW) f32


# ----------------------------------------------------------------------------
# Pass 1: depthwise conv -> BN1 per-image (sum, sum_sq) partials (stats only)
# ----------------------------------------------------------------------------
def dw_stats_kernel(x_ref, kdw_ref, masks_ref, stats_ref, *, W):
    dw = _depthwise_flat(x_ref[0], kdw_ref, masks_ref, W)       # (C, HW) f32
    s = jnp.sum(dw, axis=1, keepdims=True)                      # (C, 1)
    ss = jnp.sum(dw * dw, axis=1, keepdims=True)                # (C, 1)
    stats_ref[...] = jnp.concatenate([s, ss], axis=1)[None]     # (1, C, 2)


# ----------------------------------------------------------------------------
# Pass 2: recompute depthwise conv -> BN1(scale/shift)+ReLU -> pointwise MXU
#         matmul -> BN2 partial stats (f32) -> bf16 slab store
# ----------------------------------------------------------------------------
def dw_bn1_pw_kernel(x_ref, kdw_ref, masks_ref, w_ref, scale1_ref, shift1_ref,
                     pw_ref, stats_ref, *, W):
    dw = _depthwise_flat(x_ref[0], kdw_ref, masks_ref, W)       # (C, HW) f32
    y = jnp.maximum(dw * scale1_ref[...] + shift1_ref[...], 0.0)
    z = jnp.dot(w_ref[...], y.astype(w_ref.dtype),              # (O,C)@(C,HW)
                preferred_element_type=jnp.float32)             # (O, HW) f32
    pw_ref[...] = z.astype(pw_ref.dtype)[None]                  # lane-dense store
    s = jnp.sum(z, axis=1, keepdims=True)                       # f32 stats before cast
    ss = jnp.sum(z * z, axis=1, keepdims=True)
    stats_ref[...] = jnp.concatenate([s, ss], axis=1)[None]     # (1, O, 2)


# ----------------------------------------------------------------------------
# Pass 3: BN2 scale/shift + ReLU
# ----------------------------------------------------------------------------
def bn2_relu_kernel(pw_ref, scale2_ref, shift2_ref, out_ref):
    z = pw_ref[...].astype(jnp.float32)                         # (1, O, THW)
    out_ref[...] = jnp.maximum(z * scale2_ref[...] + shift2_ref[...], 0.0)


# ----------------------------------------------------------------------------
# Wrapper
# ----------------------------------------------------------------------------
def depthwise_separable_forward(x, kdw, wpw, g1, b1, g2, b2,
                                matmul_dtype=jnp.bfloat16):
    """x: (N, C, H, W) f32. kdw: (C,1,3,3). wpw: (O,C,1,1). Returns (N,O,H,W)."""
    N, C, H, W = x.shape
    O = wpw.shape[0]
    HW = H * W
    cnt = float(N * HW)
    slab_dtype = matmul_dtype  # bf16 slab halves the only intermediate's HBM traffic
    slab_bytes = jnp.dtype(slab_dtype).itemsize

    # Free, layout-preserving reshape (row-major identical; no HBM pass).
    x_flat = x.reshape(N, C, HW)

    # Tiny one-time parameter packing (channels on sublanes, taps on lanes).
    kdw9 = kdw.reshape(C, 9)
    w_oc = wpw.reshape(O, C).astype(matmul_dtype)

    # Precomputed 0/1 validity masks for the 9 taps (zero padding at the image
    # edges + suppression of the row-wrap introduced by the flat lane roll).
    hh = jnp.arange(H, dtype=jnp.int32).reshape(H, 1)
    ww = jnp.arange(W, dtype=jnp.int32).reshape(1, W)
    masks = jnp.stack(
        [((hh + dy >= 0) & (hh + dy < H) & (ww + dx >= 0) & (ww + dx < W))
         .reshape(HW) for dy in (-1, 0, 1) for dx in (-1, 0, 1)],
        axis=0).astype(jnp.float32)                              # (9, HW)

    vmem = _vmem_limit_bytes()
    cp1 = pltpu.CompilerParams(dimension_semantics=("parallel",),
                               vmem_limit_bytes=vmem)

    # ---- pass 1: depthwise conv, BN1 partial stats only (grid over images) --
    cost1 = pl.CostEstimate(
        flops=2 * 9 * N * HW * C + 3 * N * HW * C, transcendentals=0,
        bytes_accessed=4 * (N * C * HW + C * 9 + 9 * HW + N * C * 2))
    stats1 = pl.pallas_call(
        functools.partial(dw_stats_kernel, W=W),
        out_shape=jax.ShapeDtypeStruct((N, C, 2), jnp.float32),
        grid=(N,),
        in_specs=[pl.BlockSpec((1, C, HW), lambda n: (n, 0, 0)),
                  pl.BlockSpec((C, 9), lambda n: (0, 0)),
                  pl.BlockSpec((9, HW), lambda n: (0, 0))],
        out_specs=pl.BlockSpec((1, C, 2), lambda n: (n, 0, 0)),
        compiler_params=cp1,
        cost_estimate=cost1,
    )(x_flat, kdw9, masks)

    # Finalize BN1 (biased batch var) and fold to scale/shift.
    # TODO(synk): E[x^2]-E[x]^2 in f32 is cancellation-prone for large |mean|;
    # switch to shifted / Welford-style partials if this feeds training.
    s1 = jnp.sum(stats1, axis=0)                                 # (C, 2)
    mean1 = s1[:, 0] / cnt
    var1 = jnp.maximum(s1[:, 1] / cnt - mean1 * mean1, 0.0)
    scale1v = g1 * lax.rsqrt(var1 + EPS)
    scale1 = scale1v.reshape(C, 1)
    shift1 = (b1 - mean1 * scale1v).reshape(C, 1)

    # ---- pass 2: conv recompute + BN1+ReLU + pointwise matmul + BN2 stats ---
    cost2 = pl.CostEstimate(
        flops=2 * 9 * N * HW * C + 2 * N * HW * C * O + 7 * N * HW * O,
        transcendentals=0,
        bytes_accessed=(4 * N * C * HW + 4 * (C * 9 + 9 * HW + 2 * C)
                        + O * C * jnp.dtype(matmul_dtype).itemsize
                        + N * O * HW * slab_bytes + 4 * N * O * 2))
    pw_slab, stats2 = pl.pallas_call(
        functools.partial(dw_bn1_pw_kernel, W=W),
        out_shape=(jax.ShapeDtypeStruct((N, O, HW), slab_dtype),
                   jax.ShapeDtypeStruct((N, O, 2), jnp.float32)),
        grid=(N,),
        in_specs=[pl.BlockSpec((1, C, HW), lambda n: (n, 0, 0)),
                  pl.BlockSpec((C, 9), lambda n: (0, 0)),
                  pl.BlockSpec((9, HW), lambda n: (0, 0)),
                  pl.BlockSpec((O, C), lambda n: (0, 0)),
                  pl.BlockSpec((C, 1), lambda n: (0, 0)),
                  pl.BlockSpec((C, 1), lambda n: (0, 0))],
        out_specs=(pl.BlockSpec((1, O, HW), lambda n: (n, 0, 0)),
                   pl.BlockSpec((1, O, 2), lambda n: (n, 0, 0))),
        compiler_params=cp1,
        cost_estimate=cost2,
    )(x_flat, kdw9, masks, w_oc, scale1, shift1)

    s2 = jnp.sum(stats2, axis=0)                                 # (O, 2)
    mean2 = s2[:, 0] / cnt
    var2 = jnp.maximum(s2[:, 1] / cnt - mean2 * mean2, 0.0)
    scale2v = g2 * lax.rsqrt(var2 + EPS)
    scale2 = scale2v.reshape(O, 1)
    shift2 = (b2 - mean2 * scale2v).reshape(O, 1)

    # ---- pass 3: BN2 + ReLU (grid over images x lane-dense HW tiles) --------
    thw = _pick_hw_tile(HW)
    n_t = HW // thw
    cost3 = pl.CostEstimate(
        flops=3 * N * HW * O, transcendentals=0,
        bytes_accessed=N * O * HW * (slab_bytes + 4) + 4 * 4 * O)
    out_flat = pl.pallas_call(
        bn2_relu_kernel,
        out_shape=jax.ShapeDtypeStruct((N, O, HW), jnp.float32),
        grid=(N, n_t),
        in_specs=[pl.BlockSpec((1, O, thw), lambda n, t: (n, 0, t)),
                  pl.BlockSpec((O, 1), lambda n, t: (0, 0)),
                  pl.BlockSpec((O, 1), lambda n, t: (0, 0))],
        out_specs=pl.BlockSpec((1, O, thw), lambda n, t: (n, 0, t)),
        compiler_params=pltpu.CompilerParams(
            dimension_semantics=("parallel", "parallel"),
            vmem_limit_bytes=vmem),
        cost_estimate=cost3,
    )(pw_slab, scale2, shift2)

    # Free reshape back to NCHW (identical row-major layout, no HBM pass).
    return out_flat.reshape(N, O, H, W)


# ----------------------------------------------------------------------------
# Pure-JAX reference (lax convs + training-mode BN)
# ----------------------------------------------------------------------------
def reference_forward(x, kdw, wpw, g1, b1, g2, b2, eps=EPS):
    C = x.shape[1]

    def bn(v, g, b):
        m = jnp.mean(v, axis=(0, 2, 3), keepdims=True)
        var = jnp.mean((v - m) ** 2, axis=(0, 2, 3), keepdims=True)
        return ((v - m) * lax.rsqrt(var + eps)
                * g.reshape(1, -1, 1, 1) + b.reshape(1, -1, 1, 1))

    dw = lax.conv_general_dilated(
        x, kdw, (1, 1), ((1, 1), (1, 1)), feature_group_count=C,
        dimension_numbers=('NCHW', 'OIHW', 'NCHW'))
    y = jnp.maximum(bn(dw, g1, b1), 0.0)
    pw = lax.conv_general_dilated(
        y, wpw, (1, 1), ((0, 0), (0, 0)),
        dimension_numbers=('NCHW', 'OIHW', 'NCHW'))
    return jnp.maximum(bn(pw, g2, b2), 0.0)


if __name__ == "__main__":
    N, C, O, H, W = 2, 4, 8, 16, 16
    key = jax.random.PRNGKey(0)
    kx, kd, kp = jax.random.split(key, 3)

    x = jax.random.normal(kx, (N, C, H, W), jnp.float32)
    kdw = jax.random.normal(kd, (C, 1, 3, 3), jnp.float32)    # depthwise weight
    wpw = jax.random.normal(kp, (O, C, 1, 1), jnp.float32)    # pointwise weight
    g1 = jnp.ones((C,), jnp.float32)                          # BN default init
    b1 = jnp.zeros((C,), jnp.float32)
    g2 = jnp.ones((O,), jnp.float32)
    b2 = jnp.zeros((O,), jnp.float32)

    fwd = jax.jit(depthwise_separable_forward, static_argnames=("matmul_dtype",))
    ref = reference_forward(x, kdw, wpw, g1, b1, g2, b2)

    # f32 MXU / f32 slab path: tight check against the f32 reference.
    out_f32 = jax.block_until_ready(
        fwd(x, kdw, wpw, g1, b1, g2, b2, matmul_dtype=jnp.float32))
    assert out_f32.shape == (N, O, H, W)
    assert jnp.allclose(out_f32, ref, atol=1e-3, rtol=1e-3), float(
        jnp.max(jnp.abs(out_f32 - ref)))

    # Default bf16 path (bf16 MXU inputs + bf16 intermediate slab, f32 stats):
    # looser tolerance for the rounding of the pointwise activations.
    out_bf16 = jax.block_until_ready(fwd(x, kdw, wpw, g1, b1, g2, b2))
    assert out_bf16.shape == (N, O, H, W)
    assert jnp.allclose(out_bf16, ref, atol=5e-2, rtol=5e-2), float(
        jnp.max(jnp.abs(out_bf16 - ref)))

    print("KERNEL_OK")
</pallas_src>

<mosaic_0001>
module attributes {stable_mosaic.version = 11 : i64} {
  func.func @dw_stats_kernel(%arg0: i32, %arg1: memref<1x4x256xf32, #tpu.memory_space<vmem>>, %arg2: memref<4x9xf32, #tpu.memory_space<vmem>>, %arg3: memref<9x256xf32, #tpu.memory_space<vmem>>, %arg4: memref<1x4x2xf32, #tpu.memory_space<vmem>>) attributes {dimension_semantics = [#tpu.dimension_semantics<parallel>], iteration_bounds = array<i64: 2>, scalar_prefetch = 0 : i64, scratch_operands = 0 : i64, tpu.core_type = #tpu.core_type<tc>, window_params = [{transform_indices = @transform_0, window_bounds = array<i64: 1, 4, 256>}, {pipeline_mode = #tpu.pipeline_mode<synchronous>, transform_indices = @transform_1, window_bounds = array<i64: 4, 9>}, {pipeline_mode = #tpu.pipeline_mode<synchronous>, transform_indices = @transform_2, window_bounds = array<i64: 9, 256>}, {transform_indices = @transform_3, window_bounds = array<i64: 1, 4, 2>}]} {
    %c0 = arith.constant 0 : index
    %c0_0 = arith.constant 0 : index
    %c0_1 = arith.constant 0 : index
    %0 = vector.load %arg1[%c0, %c0_0, %c0_1] : memref<1x4x256xf32, #tpu.memory_space<vmem>>, vector<1x4x256xf32>
    %1 = vector.shape_cast %0 : vector<1x4x256xf32> to vector<4x256xf32>
    %c0_2 = arith.constant 0 : index
    %c0_3 = arith.constant 0 : index
    %2 = vector.load %arg2[%c0_2, %c0_3] : memref<4x9xf32, #tpu.memory_space<vmem>>, vector<4x1xf32>
    %c17_i32 = arith.constant 17 : i32
    %3 = tpu.dynamic_rotate %1 by %c17_i32 dim 1 : vector<4x256xf32>, i32 -> vector<4x256xf32>
    %c0_4 = arith.constant 0 : index
    %c0_5 = arith.constant 0 : index
    %4 = vector.load %arg3[%c0_4, %c0_5] : memref<9x256xf32, #tpu.memory_space<vmem>>, vector<1x256xf32>
    %5 = vector.broadcast %4 : vector<1x256xf32> to vector<4x256xf32>
    %6 = arith.mulf %3, %5 : vector<4x256xf32>
    %7 = vector.broadcast %2 : vector<4x1xf32> to vector<4x256xf32>
    %8 = arith.mulf %6, %7 : vector<4x256xf32>
    %c0_6 = arith.constant 0 : index
    %c1 = arith.constant 1 : index
    %9 = vector.load %arg2[%c0_6, %c1] : memref<4x9xf32, #tpu.memory_space<vmem>>, vector<4x1xf32>
    %c16_i32 = arith.constant 16 : i32
    %10 = tpu.dynamic_rotate %1 by %c16_i32 dim 1 : vector<4x256xf32>, i32 -> vector<4x256xf32>
    %c1_7 = arith.constant 1 : index
    %c0_8 = arith.constant 0 : index
    %11 = vector.load %arg3[%c1_7, %c0_8] : memref<9x256xf32, #tpu.memory_space<vmem>>, vector<1x256xf32>
    %12 = vector.broadcast %11 : vector<1x256xf32> to vector<4x256xf32>
    %13 = arith.mulf %10, %12 : vector<4x256xf32>
    %14 = vector.broadcast %9 : vector<4x1xf32> to vector<4x256xf32>
    %15 = arith.mulf %13, %14 : vector<4x256xf32>
    %16 = arith.addf %8, %15 : vector<4x256xf32>
    %c0_9 = arith.constant 0 : index
    %c2 = arith.constant 2 : index
    %17 = vector.load %arg2[%c0_9, %c2] : memref<4x9xf32, #tpu.memory_space<vmem>>, vector<4x1xf32>
    %c15_i32 = arith.constant 15 : i32
    %18 = tpu.dynamic_rotate %1 by %c15_i32 dim 1 : vector<4x256xf32>, i32 -> vector<4x256xf32>
    %c2_10 = arith.constant 2 : index
    %c0_11 = arith.constant 0 : index
    %19 = vector.load %arg3[%c2_10, %c0_11] : memref<9x256xf32, #tpu.memory_space<vmem>>, vector<1x256xf32>
    %20 = vector.broadcast %19 : vector<1x256xf32> to vector<4x256xf32>
    %21 = arith.mulf %18, %20 : vector<4x256xf32>
    %22 = vector.broadcast %17 : vector<4x1xf32> to vector<4x256xf32>
    %23 = arith.mulf %21, %22 : vector<4x256xf32>
    %24 = arith.addf %16, %23 : vector<4x256xf32>
    %c0_12 = arith.constant 0 : index
    %c3 = arith.constant 3 : index
    %25 = vector.load %arg2[%c0_12, %c3] : memref<4x9xf32, #tpu.memory_space<vmem>>, vector<4x1xf32>
    %c1_i32 = arith.constant 1 : i32
    %26 = tpu.dynamic_rotate %1 by %c1_i32 dim 1 : vector<4x256xf32>, i32 -> vector<4x256xf32>
    %c3_13 = arith.constant 3 : index
    %c0_14 = arith.constant 0 : index
    %27 = vector.load %arg3[%c3_13, %c0_14] : memref<9x256xf32, #tpu.memory_space<vmem>>, vector<1x256xf32>
    %28 = vector.broadcast %27 : vector<1x256xf32> to vector<4x256xf32>
    %29 = arith.mulf %26, %28 : vector<4x256xf32>
    %30 = vector.broadcast %25 : vector<4x1xf32> to vector<4x256xf32>
    %31 = arith.mulf %29, %30 : vector<4x256xf32>
    %32 = arith.addf %24, %31 : vector<4x256xf32>
    %c0_15 = arith.constant 0 : index
    %c4 = arith.constant 4 : index
    %33 = vector.load %arg2[%c0_15, %c4] : memref<4x9xf32, #tpu.memory_space<vmem>>, vector<4x1xf32>
    %34 = vector.broadcast %33 : vector<4x1xf32> to vector<4x256xf32>
    %35 = arith.mulf %1, %34 : vector<4x256xf32>
    %36 = arith.addf %32, %35 : vector<4x256xf32>
    %c0_16 = arith.constant 0 : index
    %c5 = arith.constant 5 : index
    %37 = vector.load %arg2[%c0_16, %c5] : memref<4x9xf32, #tpu.memory_space<vmem>>, vector<4x1xf32>
    %c255_i32 = arith.constant 255 : i32
    %38 = tpu.dynamic_rotate %1 by %c255_i32 dim 1 : vector<4x256xf32>, i32 -> vector<4x256xf32>
    %c5_17 = arith.constant 5 : index
    %c0_18 = arith.constant 0 : index
    %39 = vector.load %arg3[%c5_17, %c0_18] : memref<9x256xf32, #tpu.memory_space<vmem>>, vector<1x256xf32>
    %40 = vector.broadcast %39 : vector<1x256xf32> to vector<4x256xf32>
    %41 = arith.mulf %38, %40 : vector<4x256xf32>
    %42 = vector.broadcast %37 : vector<4x1xf32> to vector<4x256xf32>
    %43 = arith.mulf %41, %42 : vector<4x256xf32>
    %44 = arith.addf %36, %43 : vector<4x256xf32>
    %c0_19 = arith.constant 0 : index
    %c6 = arith.constant 6 : index
    %45 = vector.load %arg2[%c0_19, %c6] : memref<4x9xf32, #tpu.memory_space<vmem>>, vector<4x1xf32>
    %c241_i32 = arith.constant 241 : i32
    %46 = tpu.dynamic_rotate %1 by %c241_i32 dim 1 : vector<4x256xf32>, i32 -> vector<4x256xf32>
    %c6_20 = arith.constant 6 : index
    %c0_21 = arith.constant 0 : index
    %47 = vector.load %arg3[%c6_20, %c0_21] : memref<9x256xf32, #tpu.memory_space<vmem>>, vector<1x256xf32>
    %48 = vector.broadcast %47 : vector<1x256xf32> to vector<4x256xf32>
    %49 = arith.mulf %46, %48 : vector<4x256xf32>
    %50 = vector.broadcast %45 : vector<4x1xf32> to vector<4x256xf32>
    %51 = arith.mulf %49, %50 : vector<4x256xf32>
    %52 = arith.addf %44, %51 : vector<4x256xf32>
    %c0_22 = arith.constant 0 : index
    %c7 = arith.constant 7 : index
    %53 = vector.load %arg2[%c0_22, %c7] : memref<4x9xf32, #tpu.memory_space<vmem>>, vector<4x1xf32>
    %c240_i32 = arith.constant 240 : i32
    %54 = tpu.dynamic_rotate %1 by %c240_i32 dim 1 : vector<4x256xf32>, i32 -> vector<4x256xf32>
    %c7_23 = arith.constant 7 : index
    %c0_24 = arith.constant 0 : index
    %55 = vector.load %arg3[%c7_23, %c0_24] : memref<9x256xf32, #tpu.memory_space<vmem>>, vector<1x256xf32>
    %56 = vector.broadcast %55 : vector<1x256xf32> to vector<4x256xf32>
    %57 = arith.mulf %54, %56 : vector<4x256xf32>
    %58 = vector.broadcast %53 : vector<4x1xf32> to vector<4x256xf32>
    %59 = arith.mulf %57, %58 : vector<4x256xf32>
    %60 = arith.addf %52, %59 : vector<4x256xf32>
    %c0_25 = arith.constant 0 : index
    %c8 = arith.constant 8 : index
    %61 = vector.load %arg2[%c0_25, %c8] : memref<4x9xf32, #tpu.memory_space<vmem>>, vector<4x1xf32>
    %c239_i32 = arith.constant 239 : i32
    %62 = tpu.dynamic_rotate %1 by %c239_i32 dim 1 : vector<4x256xf32>, i32 -> vector<4x256xf32>
    %c8_26 = arith.constant 8 : index
    %c0_27 = arith.constant 0 : index
    %63 = vector.load %arg3[%c8_26, %c0_27] : memref<9x256xf32, #tpu.memory_space<vmem>>, vector<1x256xf32>
    %64 = vector.broadcast %63 : vector<1x256xf32> to vector<4x256xf32>
    %65 = arith.mulf %62, %64 : vector<4x256xf32>
    %66 = vector.broadcast %61 : vector<4x1xf32> to vector<4x256xf32>
    %67 = arith.mulf %65, %66 : vector<4x256xf32>
    %68 = arith.addf %60, %67 : vector<4x256xf32>
    %cst = arith.constant dense<0.000000e+00> : vector<4xf32>
    %69 = vector.multi_reduction <add>, %68, %cst [1] : vector<4x256xf32> to vector<4xf32>
    %70 = vector.shape_cast %69 : vector<4xf32> to vector<4x1xf32>
    %71 = arith.mulf %68, %68 : vector<4x256xf32>
    %cst_28 = arith.constant dense<0.000000e+00> : vector<4xf32>
    %72 = vector.multi_reduction <add>, %71, %cst_28 [1] : vector<4x256xf32> to vector<4xf32>
    %73 = vector.shape_cast %72 : vector<4xf32> to vector<4x1xf32>
    %74 = tpu.concatenate %70, %73 in 1 : vector<4x1xf32>, vector<4x1xf32> -> vector<4x2xf32>
    %75 = vector.shape_cast %74 : vector<4x2xf32> to vector<1x4x2xf32>
    %c0_29 = arith.constant 0 : index
    %c0_30 = arith.constant 0 : index
    %c0_31 = arith.constant 0 : index
    %76 = vector.load %arg4[%c0_29, %c0_30, %c0_31] : memref<1x4x2xf32, #tpu.memory_space<vmem>>, vector<1x4x2xf32>
    tpu.vector_store %arg4[%c0_29, %c0_30, %c0_31], %75 {strides = array<i32>} : memref<1x4x2xf32, #tpu.memory_space<vmem>>, vector<1x4x2xf32>,
    return
  }
  func.func @transform_0(%arg0: i32) -> (i32, i32, i32) {
    %c0_i32 = arith.constant 0 : i32
    %c0_i32_0 = arith.constant 0 : i32
    %c0_i32_1 = arith.constant 0 : i32
    return %arg0, %c0_i32, %c0_i32_0 : i32, i32, i32
  }
  func.func @transform_1(%arg0: i32) -> (i32, i32) {
    %c0_i32 = arith.constant 0 : i32
    %c0_i32_0 = arith.constant 0 : i32
    %c0_i32_1 = arith.constant 0 : i32
    return %c0_i32, %c0_i32_0 : i32, i32
  }
  func.func @transform_2(%arg0: i32) -> (i32, i32) {
    %c0_i32 = arith.constant 0 : i32
    %c0_i32_0 = arith.constant 0 : i32
    %c0_i32_1 = arith.constant 0 : i32
    return %c0_i32, %c0_i32_0 : i32, i32
  }
  func.func @transform_3(%arg0: i32) -> (i32, i32, i32) {
    %c0_i32 = arith.constant 0 : i32
    %c0_i32_0 = arith.constant 0 : i32
    %c0_i32_1 = arith.constant 0 : i32
    return %arg0, %c0_i32, %c0_i32_0 : i32, i32, i32
  }
}

module attributes {stable_mosaic.version = 11 : i64} {
  func.func @dw_bn1_pw_kernel(%arg0: i32, %arg1: memref<1x4x256xf32, #tpu.memory_space<vmem>>, %arg2: memref<4x9xf32, #tpu.memory_space<vmem>>, %arg3: memref<9x256xf32, #tpu.memory_space<vmem>>, %arg4: memref<8x4xf32, #tpu.memory_space<vmem>>, %arg5: memref<4x1xf32, #tpu.memory_space<vmem>>, %arg6: memref<4x1xf32, #tpu.memory_space<vmem>>, %arg7: memref<1x8x256xf32, #tpu.memory_space<vmem>>, %arg8: memref<1x8x2xf32, #tpu.memory_space<vmem>>) attributes {dimension_semantics = [#tpu.dimension_semantics<parallel>], iteration_bounds = array<i64: 2>, scalar_prefetch = 0 : i64, scratch_operands = 0 : i64, tpu.core_type = #tpu.core_type<tc>, window_params = [{transform_indices = @transform_0, window_bounds = array<i64: 1, 4, 256>}, {pipeline_mode = #tpu.pipeline_mode<synchronous>, transform_indices = @transform_1, window_bounds = array<i64: 4, 9>}, {pipeline_mode = #tpu.pipeline_mode<synchronous>, transform_indices = @transform_2, window_bounds = array<i64: 9, 256>}, {pipeline_mode = #tpu.pipeline_mode<synchronous>, transform_indices = @transform_3, window_bounds = array<i64: 8, 4>}, {pipeline_mode = #tpu.pipeline_mode<synchronous>, transform_indices = @transform_4, window_bounds = array<i64: 4, 1>}, {pipeline_mode = #tpu.pipeline_mode<synchronous>, transform_indices = @transform_5, window_bounds = array<i64: 4, 1>}, {transform_indices = @transform_6, window_bounds = array<i64: 1, 8, 256>}, {transform_indices = @transform_7, window_bounds = array<i64: 1, 8, 2>}]} {
    %c0 = arith.constant 0 : index
    %c0_0 = arith.constant 0 : index
    %c0_1 = arith.constant 0 : index
    %0 = vector.load %arg1[%c0, %c0_0, %c0_1] : memref<1x4x256xf32, #tpu.memory_space<vmem>>, vector<1x4x256xf32>
    %1 = vector.shape_cast %0 : vector<1x4x256xf32> to vector<4x256xf32>
    %c0_2 = arith.constant 0 : index
    %c0_3 = arith.constant 0 : index
    %2 = vector.load %arg2[%c0_2, %c0_3] : memref<4x9xf32, #tpu.memory_space<vmem>>, vector<4x1xf32>
    %c17_i32 = arith.constant 17 : i32
    %3 = tpu.dynamic_rotate %1 by %c17_i32 dim 1 : vector<4x256xf32>, i32 -> vector<4x256xf32>
    %c0_4 = arith.constant 0 : index
    %c0_5 = arith.constant 0 : index
    %4 = vector.load %arg3[%c0_4, %c0_5] : memref<9x256xf32, #tpu.memory_space<vmem>>, vector<1x256xf32>
    %5 = vector.broadcast %4 : vector<1x256xf32> to vector<4x256xf32>
    %6 = arith.mulf %3, %5 : vector<4x256xf32>
    %7 = vector.broadcast %2 : vector<4x1xf32> to vector<4x256xf32>
    %8 = arith.mulf %6, %7 : vector<4x256xf32>
    %c0_6 = arith.constant 0 : index
    %c1 = arith.constant 1 : index
    %9 = vector.load %arg2[%c0_6, %c1] : memref<4x9xf32, #tpu.memory_space<vmem>>, vector<4x1xf32>
    %c16_i32 = arith.constant 16 : i32
    %10 = tpu.dynamic_rotate %1 by %c16_i32 dim 1 : vector<4x256xf32>, i32 -> vector<4x256xf32>
    %c1_7 = arith.constant 1 : index
    %c0_8 = arith.constant 0 : index
    %11 = vector.load %arg3[%c1_7, %c0_8] : memref<9x256xf32, #tpu.memory_space<vmem>>, vector<1x256xf32>
    %12 = vector.broadcast %11 : vector<1x256xf32> to vector<4x256xf32>
    %13 = arith.mulf %10, %12 : vector<4x256xf32>
    %14 = vector.broadcast %9 : vector<4x1xf32> to vector<4x256xf32>
    %15 = arith.mulf %13, %14 : vector<4x256xf32>
    %16 = arith.addf %8, %15 : vector<4x256xf32>
    %c0_9 = arith.constant 0 : index
    %c2 = arith.constant 2 : index
    %17 = vector.load %arg2[%c0_9, %c2] : memref<4x9xf32, #tpu.memory_space<vmem>>, vector<4x1xf32>
    %c15_i32 = arith.constant 15 : i32
    %18 = tpu.dynamic_rotate %1 by %c15_i32 dim 1 : vector<4x256xf32>, i32 -> vector<4x256xf32>
    %c2_10 = arith.constant 2 : index
    %c0_11 = arith.constant 0 : index
    %19 = vector.load %arg3[%c2_10, %c0_11] : memref<9x256xf32, #tpu.memory_space<vmem>>, vector<1x256xf32>
    %20 = vector.broadcast %19 : vector<1x256xf32> to vector<4x256xf32>
    %21 = arith.mulf %18, %20 : vector<4x256xf32>
    %22 = vector.broadcast %17 : vector<4x1xf32> to vector<4x256xf32>
    %23 = arith.mulf %21, %22 : vector<4x256xf32>
    %24 = arith.addf %16, %23 : vector<4x256xf32>
    %c0_12 = arith.constant 0 : index
    %c3 = arith.constant 3 : index
    %25 = vector.load %arg2[%c0_12, %c3] : memref<4x9xf32, #tpu.memory_space<vmem>>, vector<4x1xf32>
    %c1_i32 = arith.constant 1 : i32
    %26 = tpu.dynamic_rotate %1 by %c1_i32 dim 1 : vector<4x256xf32>, i32 -> vector<4x256xf32>
    %c3_13 = arith.constant 3 : index
    %c0_14 = arith.constant 0 : index
    %27 = vector.load %arg3[%c3_13, %c0_14] : memref<9x256xf32, #tpu.memory_space<vmem>>, vector<1x256xf32>
    %28 = vector.broadcast %27 : vector<1x256xf32> to vector<4x256xf32>
    %29 = arith.mulf %26, %28 : vector<4x256xf32>
    %30 = vector.broadcast %25 : vector<4x1xf32> to vector<4x256xf32>
    %31 = arith.mulf %29, %30 : vector<4x256xf32>
    %32 = arith.addf %24, %31 : vector<4x256xf32>
    %c0_15 = arith.constant 0 : index
    %c4 = arith.constant 4 : index
    %33 = vector.load %arg2[%c0_15, %c4] : memref<4x9xf32, #tpu.memory_space<vmem>>, vector<4x1xf32>
    %34 = vector.broadcast %33 : vector<4x1xf32> to vector<4x256xf32>
    %35 = arith.mulf %1, %34 : vector<4x256xf32>
    %36 = arith.addf %32, %35 : vector<4x256xf32>
    %c0_16 = arith.constant 0 : index
    %c5 = arith.constant 5 : index
    %37 = vector.load %arg2[%c0_16, %c5] : memref<4x9xf32, #tpu.memory_space<vmem>>, vector<4x1xf32>
    %c255_i32 = arith.constant 255 : i32
    %38 = tpu.dynamic_rotate %1 by %c255_i32 dim 1 : vector<4x256xf32>, i32 -> vector<4x256xf32>
    %c5_17 = arith.constant 5 : index
    %c0_18 = arith.constant 0 : index
    %39 = vector.load %arg3[%c5_17, %c0_18] : memref<9x256xf32, #tpu.memory_space<vmem>>, vector<1x256xf32>
    %40 = vector.broadcast %39 : vector<1x256xf32> to vector<4x256xf32>
    %41 = arith.mulf %38, %40 : vector<4x256xf32>
    %42 = vector.broadcast %37 : vector<4x1xf32> to vector<4x256xf32>
    %43 = arith.mulf %41, %42 : vector<4x256xf32>
    %44 = arith.addf %36, %43 : vector<4x256xf32>
    %c0_19 = arith.constant 0 : index
    %c6 = arith.constant 6 : index
    %45 = vector.load %arg2[%c0_19, %c6] : memref<4x9xf32, #tpu.memory_space<vmem>>, vector<4x1xf32>
    %c241_i32 = arith.constant 241 : i32
    %46 = tpu.dynamic_rotate %1 by %c241_i32 dim 1 : vector<4x256xf32>, i32 -> vector<4x256xf32>
    %c6_20 = arith.constant 6 : index
    %c0_21 = arith.constant 0 : index
    %47 = vector.load %arg3[%c6_20, %c0_21] : memref<9x256xf32, #tpu.memory_space<vmem>>, vector<1x256xf32>
    %48 = vector.broadcast %47 : vector<1x256xf32> to vector<4x256xf32>
    %49 = arith.mulf %46, %48 : vector<4x256xf32>
    %50 = vector.broadcast %45 : vector<4x1xf32> to vector<4x256xf32>
    %51 = arith.mulf %49, %50 : vector<4x256xf32>
    %52 = arith.addf %44, %51 : vector<4x256xf32>
    %c0_22 = arith.constant 0 : index
    %c7 = arith.constant 7 : index
    %53 = vector.load %arg2[%c0_22, %c7] : memref<4x9xf32, #tpu.memory_space<vmem>>, vector<4x1xf32>
    %c240_i32 = arith.constant 240 : i32
    %54 = tpu.dynamic_rotate %1 by %c240_i32 dim 1 : vector<4x256xf32>, i32 -> vector<4x256xf32>
    %c7_23 = arith.constant 7 : index
    %c0_24 = arith.constant 0 : index
    %55 = vector.load %arg3[%c7_23, %c0_24] : memref<9x256xf32, #tpu.memory_space<vmem>>, vector<1x256xf32>
    %56 = vector.broadcast %55 : vector<1x256xf32> to vector<4x256xf32>
    %57 = arith.mulf %54, %56 : vector<4x256xf32>
    %58 = vector.broadcast %53 : vector<4x1xf32> to vector<4x256xf32>
    %59 = arith.mulf %57, %58 : vector<4x256xf32>
    %60 = arith.addf %52, %59 : vector<4x256xf32>
    %c0_25 = arith.constant 0 : index
    %c8 = arith.constant 8 : index
    %61 = vector.load %arg2[%c0_25, %c8] : memref<4x9xf32, #tpu.memory_space<vmem>>, vector<4x1xf32>
    %c239_i32 = arith.constant 239 : i32
    %62 = tpu.dynamic_rotate %1 by %c239_i32 dim 1 : vector<4x256xf32>, i32 -> vector<4x256xf32>
    %c8_26 = arith.constant 8 : index
    %c0_27 = arith.constant 0 : index
    %63 = vector.load %arg3[%c8_26, %c0_27] : memref<9x256xf32, #tpu.memory_space<vmem>>, vector<1x256xf32>
    %64 = vector.broadcast %63 : vector<1x256xf32> to vector<4x256xf32>
    %65 = arith.mulf %62, %64 : vector<4x256xf32>
    %66 = vector.broadcast %61 : vector<4x1xf32> to vector<4x256xf32>
    %67 = arith.mulf %65, %66 : vector<4x256xf32>
    %68 = arith.addf %60, %67 : vector<4x256xf32>
    %c0_28 = arith.constant 0 : index
    %c0_29 = arith.constant 0 : index
    %69 = vector.load %arg5[%c0_28, %c0_29] : memref<4x1xf32, #tpu.memory_space<vmem>>, vector<4x1xf32>
    %70 = vector.broadcast %69 : vector<4x1xf32> to vector<4x256xf32>
    %71 = arith.mulf %68, %70 : vector<4x256xf32>
    %c0_30 = arith.constant 0 : index
    %c0_31 = arith.constant 0 : index
    %72 = vector.load %arg6[%c0_30, %c0_31] : memref<4x1xf32, #tpu.memory_space<vmem>>, vector<4x1xf32>
    %73 = vector.broadcast %72 : vector<4x1xf32> to vector<4x256xf32>
    %74 = arith.addf %71, %73 : vector<4x256xf32>
    %cst = arith.constant 0.000000e+00 : f32
    %75 = vector.broadcast %cst : f32 to vector<4x256xf32>
    %76 = arith.maximumf %74, %75 : vector<4x256xf32>
    %c0_32 = arith.constant 0 : index
    %c0_33 = arith.constant 0 : index
    %77 = vector.load %arg4[%c0_32, %c0_33] : memref<8x4xf32, #tpu.memory_space<vmem>>, vector<8x4xf32>
    %cst_34 = arith.constant dense<0.000000e+00> : vector<8x256xf32>
    %78 = tpu.matmul %77, %76, %cst_34 {dimension_numbers = #tpu.dot_dimension_numbers<[1], [0], [0], [1], [0, 0, 1, 1], [], []>} : vector<8x4xf32>, vector<4x256xf32>, vector<8x256xf32> -> vector<8x256xf32>
    %79 = vector.shape_cast %78 : vector<8x256xf32> to vector<1x8x256xf32>
    %c0_35 = arith.constant 0 : index
    %c0_36 = arith.constant 0 : index
    %c0_37 = arith.constant 0 : index
    %80 = vector.load %arg7[%c0_35, %c0_36, %c0_37] : memref<1x8x256xf32, #tpu.memory_space<vmem>>, vector<1x8x256xf32>
    tpu.vector_store %arg7[%c0_35, %c0_36, %c0_37], %79 {strides = array<i32>} : memref<1x8x256xf32, #tpu.memory_space<vmem>>, vector<1x8x256xf32>,
    %cst_38 = arith.constant dense<0.000000e+00> : vector<8xf32>
    %81 = vector.multi_reduction <add>, %78, %cst_38 [1] : vector<8x256xf32> to vector<8xf32>
    %82 = vector.shape_cast %81 : vector<8xf32> to vector<8x1xf32>
    %83 = arith.mulf %78, %78 : vector<8x256xf32>
    %cst_39 = arith.constant dense<0.000000e+00> : vector<8xf32>
    %84 = vector.multi_reduction <add>, %83, %cst_39 [1] : vector<8x256xf32> to vector<8xf32>
    %85 = vector.shape_cast %84 : vector<8xf32> to vector<8x1xf32>
    %86 = tpu.concatenate %82, %85 in 1 : vector<8x1xf32>, vector<8x1xf32> -> vector<8x2xf32>
    %87 = vector.shape_cast %86 : vector<8x2xf32> to vector<1x8x2xf32>
    %c0_40 = arith.constant 0 : index
    %c0_41 = arith.constant 0 : index
    %c0_42 = arith.constant 0 : index
    %88 = vector.load %arg8[%c0_40, %c0_41, %c0_42] : memref<1x8x2xf32, #tpu.memory_space<vmem>>, vector<1x8x2xf32>
    tpu.vector_store %arg8[%c0_40, %c0_41, %c0_42], %87 {strides = array<i32>} : memref<1x8x2xf32, #tpu.memory_space<vmem>>, vector<1x8x2xf32>,
    return
  }
  func.func @transform_0(%arg0: i32) -> (i32, i32, i32) {
    %c0_i32 = arith.constant 0 : i32
    %c0_i32_0 = arith.constant 0 : i32
    %c0_i32_1 = arith.constant 0 : i32
    return %arg0, %c0_i32, %c0_i32_0 : i32, i32, i32
  }
  func.func @transform_1(%arg0: i32) -> (i32, i32) {
    %c0_i32 = arith.constant 0 : i32
    %c0_i32_0 = arith.constant 0 : i32
    %c0_i32_1 = arith.constant 0 : i32
    return %c0_i32, %c0_i32_0 : i32, i32
  }
  func.func @transform_2(%arg0: i32) -> (i32, i32) {
    %c0_i32 = arith.constant 0 : i32
    %c0_i32_0 = arith.constant 0 : i32
    %c0_i32_1 = arith.constant 0 : i32
    return %c0_i32, %c0_i32_0 : i32, i32
  }
  func.func @transform_3(%arg0: i32) -> (i32, i32) {
    %c0_i32 = arith.constant 0 : i32
    %c0_i32_0 = arith.constant 0 : i32
    %c0_i32_1 = arith.constant 0 : i32
    return %c0_i32, %c0_i32_0 : i32, i32
  }
  func.func @transform_4(%arg0: i32) -> (i32, i32) {
    %c0_i32 = arith.constant 0 : i32
    %c0_i32_0 = arith.constant 0 : i32
    %c0_i32_1 = arith.constant 0 : i32
    return %c0_i32, %c0_i32_0 : i32, i32
  }
  func.func @transform_5(%arg0: i32) -> (i32, i32) {
    %c0_i32 = arith.constant 0 : i32
    %c0_i32_0 = arith.constant 0 : i32
    %c0_i32_1 = arith.constant 0 : i32
    return %c0_i32, %c0_i32_0 : i32, i32
  }
  func.func @transform_6(%arg0: i32) -> (i32, i32, i32) {
    %c0_i32 = arith.constant 0 : i32
    %c0_i32_0 = arith.constant 0 : i32
    %c0_i32_1 = arith.constant 0 : i32
    return %arg0, %c0_i32, %c0_i32_0 : i32, i32, i32
  }
  func.func @transform_7(%arg0: i32) -> (i32, i32, i32) {
    %c0_i32 = arith.constant 0 : i32
    %c0_i32_0 = arith.constant 0 : i32
    %c0_i32_1 = arith.constant 0 : i32
    return %arg0, %c0_i32, %c0_i32_0 : i32, i32, i32
  }
}

module attributes {stable_mosaic.version = 11 : i64} {
  func.func @bn2_relu_kernel(%arg0: i32, %arg1: i32, %arg2: memref<1x8x128xf32, #tpu.memory_space<vmem>>, %arg3: memref<8x1xf32, #tpu.memory_space<vmem>>, %arg4: memref<8x1xf32, #tpu.memory_space<vmem>>, %arg5: memref<1x8x128xf32, #tpu.memory_space<vmem>>) attributes {dimension_semantics = [#tpu.dimension_semantics<parallel>, #tpu.dimension_semantics<parallel>], iteration_bounds = array<i64: 2, 2>, scalar_prefetch = 0 : i64, scratch_operands = 0 : i64, tpu.core_type = #tpu.core_type<tc>, window_params = [{transform_indices = @transform_0, window_bounds = array<i64: 1, 8, 128>}, {pipeline_mode = #tpu.pipeline_mode<synchronous>, transform_indices = @transform_1, window_bounds = array<i64: 8, 1>}, {pipeline_mode = #tpu.pipeline_mode<synchronous>, transform_indices = @transform_2, window_bounds = array<i64: 8, 1>}, {transform_indices = @transform_3, window_bounds = array<i64: 1, 8, 128>}]} {
    %c0 = arith.constant 0 : index
    %c0_0 = arith.constant 0 : index
    %c0_1 = arith.constant 0 : index
    %0 = vector.load %arg2[%c0, %c0_0, %c0_1] : memref<1x8x128xf32, #tpu.memory_space<vmem>>, vector<1x8x128xf32>
    %c0_2 = arith.constant 0 : index
    %c0_3 = arith.constant 0 : index
    %1 = vector.load %arg3[%c0_2, %c0_3] : memref<8x1xf32, #tpu.memory_space<vmem>>, vector<8x1xf32>
    %2 = vector.shape_cast %1 : vector<8x1xf32> to vector<1x8x1xf32>
    %3 = vector.broadcast %2 : vector<1x8x1xf32> to vector<1x8x128xf32>
    %4 = arith.mulf %0, %3 : vector<1x8x128xf32>
    %c0_4 = arith.constant 0 : index
    %c0_5 = arith.constant 0 : index
    %5 = vector.load %arg4[%c0_4, %c0_5] : memref<8x1xf32, #tpu.memory_space<vmem>>, vector<8x1xf32>
    %6 = vector.shape_cast %5 : vector<8x1xf32> to vector<1x8x1xf32>
    %7 = vector.broadcast %6 : vector<1x8x1xf32> to vector<1x8x128xf32>
    %8 = arith.addf %4, %7 : vector<1x8x128xf32>
    %cst = arith.constant 0.000000e+00 : f32
    %9 = vector.broadcast %cst : f32 to vector<1x8x128xf32>
    %10 = arith.maximumf %8, %9 : vector<1x8x128xf32>
    %c0_6 = arith.constant 0 : index
    %c0_7 = arith.constant 0 : index
    %c0_8 = arith.constant 0 : index
    %11 = vector.load %arg5[%c0_6, %c0_7, %c0_8] : memref<1x8x128xf32, #tpu.memory_space<vmem>>, vector<1x8x128xf32>
    tpu.vector_store %arg5[%c0_6, %c0_7, %c0_8], %10 {strides = array<i32>} : memref<1x8x128xf32, #tpu.memory_space<vmem>>, vector<1x8x128xf32>,
    return
  }
  func.func @transform_0(%arg0: i32, %arg1: i32) -> (i32, i32, i32) {
    %c0_i32 = arith.constant 0 : i32
    %c0_i32_0 = arith.constant 0 : i32
    return %arg0, %c0_i32, %arg1 : i32, i32, i32
  }
  func.func @transform_1(%arg0: i32, %arg1: i32) -> (i32, i32) {
    %c0_i32 = arith.constant 0 : i32
    %c0_i32_0 = arith.constant 0 : i32
    %c0_i32_1 = arith.constant 0 : i32
    return %c0_i32, %c0_i32_0 : i32, i32
  }
  func.func @transform_2(%arg0: i32, %arg1: i32) -> (i32, i32) {
    %c0_i32 = arith.constant 0 : i32
    %c0_i32_0 = arith.constant 0 : i32
    %c0_i32_1 = arith.constant 0 : i32
    return %c0_i32, %c0_i32_0 : i32, i32
  }
  func.func @transform_3(%arg0: i32, %arg1: i32) -> (i32, i32, i32) {
    %c0_i32 = arith.constant 0 : i32
    %c0_i32_0 = arith.constant 0 : i32
    return %arg0, %c0_i32, %arg1 : i32, i32, i32
  }
}

</mosaic_0001>

<bundles_post_ra>
// kernel: depthwise_separable_forward.5
= control target key start
LH: loop header
LB: loop body
LE: loop exit
PB: predicated region body
PF: predicated region fallthrough
CT: control target
= control target key end

     0   :  { %s419_s12 = smov 0   ;;  %s421_s13 = smov 0   ;;  %s476_s0 = inlined_call_operand.vmem [shape: f32[2,8,256], index: 0, kind: input, shape index: {}]   ;;  %s477_s1 = inlined_call_operand.vmem [shape: f32[8,1], index: 1, kind: input, shape index: {}]   ;;  %s478_s2 = inlined_call_operand.vmem [shape: f32[8,1], index: 2, kind: input, shape index: {}]   ;;  %s479_s3 = inlined_call_operand.vmem [shape: f32[2,8,256], index: 3, kind: output, shape index: {}]  }
   0x1   :  { %s423_s14 = smov 0   ;;  %s425_s15 = smov 0  }
   0x2   :  { %s427_s16 = smov 0  }
   0x3 LB: > { %s22_s17 = sadd.s32 1, %s388_s14  ;;  %s25_s18 = sadd.s32 1, %s392_s15  ;;  %s396_s16 = sphi %s427_s16, %s13_s16   ;;  %s392_s15 = sphi %s425_s15, %s483_s15   ;;  %s388_s14 = sphi %s423_s14, %s482_s14   ;;  %s384_s13 = sphi %s421_s13, %s481_s13   ;;  %s380_s12 = sphi %s419_s12, %s480_s12  }
   0x4   : > { %p23_p0 = scmp.ge.s32.totalorder %s22_s17, 2  ;;  %p309_p1 = scmp.ge.s32.totalorder %s396_s16, 1 }
   0x5   : > { %p156_p2 = scmp.lt.s32.totalorder %s396_s16, 5 }
   0x6   : > { %s485_s17 = smov (%p23_p0, %s22_s17), 0  ;;  %s487_s18 = smov (!%p23_p0, %s25_s18), %s392_s15 }
   0x7   : > { %p157_p3 = pnand %p309_p1, %p156_p2  ;;  %p27_p4 = scmp.ge.s32.totalorder %s487_s18, 2 }
   0x8   : > { %v203_v0 = vld [vmem:[%s477_s1] sm:$0xff] (!%p157_p3)  ;;  %v398_v1 = vmov (!%p157_p3), 0   ;;  %p186_p5 = scmp.lt.s32.totalorder (!%p157_p3), %s384_s13, 1  ;;  %p188_p6 = scmp.lt.s32.totalorder (!%p157_p3), %s380_s12, 1 }
   0x9   : > { %s489_s18 = smov (%p27_p4, %s487_s18), 0  ;;  %160 = sbr.rel (%p157_p3) target bundleno = 148 (0x94), region = 32 }
   0xa   : > { %357 = vset.pattern.permute.xlu0 (!%p157_p3), %v398_v1  ;;  %v210_v2 = vld [vmem:[%s478_s2] sm:$0xff] (!%p157_p3) }
   0xb   : > { %206 = vperm.xlu0 (!%p157_p3), %357, %v203_v0  }
   0xf   : > { %213 = vperm.xlu0 (!%p157_p3), %357, %v210_v2  }
  0x10   : > { %s491_s13 = smov (!%p186_p5, %s384_s13), 1  ;;  %s493_s12 = smov (!%p188_p6, %s380_s12), 1 }
  0x11   : > { %s310_s23 = sshll.u32 %s491_s13, 1 }
  0x12   : > { %s191_s24 = sadd.s32 %s310_s23, %s493_s12 }
  0x13   : > { %s311_s25 = sshll.u32 %s191_s24, 3 }
  0x14   : > { %s193_s28 = scalar_lea.vmem %s476_s0, %s311_s25  ;;  %s201_s4 = scalar_lea.vmem %s479_s3, %s311_s25 }
  0x15   : > { %v202_v4 = vld [vmem:[%s193_s28] sm:$0xff] }
  0x8a   : > { %v207_v3 = vpop.permute.xlu0 %206 }
  0x8b   : > { %v209_v5 = vmul.f32 %v207_v3, %v202_v4 }
  0x8e   : > { %v214_v6 = vpop.permute.xlu0 %213 }
  0x8f   : > { %v216_v7 = vadd.f32 %v214_v6, %v209_v5 }
  0x91   : > { %v217_v8 = vmax.f32 %v216_v7, 0.0 }
  0x93   : > { %218 = vst [vmem:[%s201_s4] sm:$0xff] %v217_v8 }
  0x94 PF: > { %s13_s16 = sadd.s32 1, %s396_s16   ;;  %s480_s12 = smov %s388_s14 }
  0x95   : > { %p10_p7 = scmp.ge.s32.totalorder %s13_s16, 6   ;;  %s481_s13 = smov %s392_s15 }
  0x96   : > { %s482_s14 = smov %s485_s17  ;;  %s483_s15 = smov %s489_s18 }
  0x97   :  { %12 = sbr.rel (!%p10_p7) target bundleno = 3 (0x3), region = 62 }

// kernel: depthwise_separable_forward.3
= control target key start
LH: loop header
LB: loop body
LE: loop exit
PB: predicated region body
PF: predicated region fallthrough
CT: control target
= control target key end

     0   :  { %s617_s12 = smov 0   ;;  %s763_s0 = inlined_call_operand.vmem [shape: f32[2,4,256], index: 0, kind: input, shape index: {}]   ;;  %s764_s1 = inlined_call_operand.vmem [shape: f32[4,9], index: 1, kind: input, shape index: {}]   ;;  %s765_s2 = inlined_call_operand.vmem [shape: f32[9,256], index: 2, kind: input, shape index: {}]   ;;  %s766_s3 = inlined_call_operand.vmem [shape: f32[2,4,2], index: 3, kind: output, shape index: {}]  }
   0x1 LB: > { %s517_s13 = sadd.s32 4294967295, %s577_s12   ;;  %p521_p0 = scmp.ge.s32.totalorder %s577_s12, 1  ;;  %s577_s12 = sphi %s617_s12, %s13_s12  }
   0x2   : > { %p137_p1 = scmp.lt.s32.totalorder %s577_s12, 3 }
   0x4   : > { %p138_p2 = pnand %p521_p0, %p137_p1 }
   0x5   : > { %v236_v0 = vld [vmem:[%s764_s1] sm:$0xf] (!%p138_p2)  ;;  %v579_v2 = vmov (!%p138_p2), 2   ;;  %v580_v3 = vmov (!%p138_p2), 0   ;;  %p160_p3 = scmp.lt.s32.totalorder (!%p138_p2), %s517_s13, 1  ;;  %v581_v6 = vmov (!%p138_p2), 4   ;;  %v178_v30 = vlaneseq (!%p138_p2) }
   0x6   : > { %141 = sbr.rel (%p138_p2) target bundleno = 345 (0x159), region = 32  ;;  %v170_v1 = vld [vmem:[%s764_s1] sm:$0xf] (!%p138_p2)  ;;  %563 = vset.pattern.permute.xlu1 (!%p138_p2), %v579_v2  ;;  %561 = vset.pattern.permute.xlu0 (!%p138_p2), %v580_v3  ;;  %v582_v7 = vmov (!%p138_p2), 1   ;;  %s583_s26 = smov (!%p138_p2), 17   ;;  %v584_v10 = vmov (!%p138_p2), 3  }
   0x7   : > { %261 = vperm.xlu1 (!%p138_p2), %563, %v236_v0   ;;  %199 = vperm.xlu0 (!%p138_p2), %561, %v170_v1   ;;  %v300_v4 = vld [vmem:[%s764_s1] sm:$0xf] (!%p138_p2)  ;;  %v585_v11 = vmov (!%p138_p2), 5   ;;  %s586_s27 = smov (!%p138_p2), 16   ;;  %s587_s30 = smov (!%p138_p2), 15   ;;  %v589_v14 = vmov (!%p138_p2), 6  }
   0x8   : > { %v204_v5 = vld [vmem:[%s764_s1] sm:$0xf] (!%p138_p2)  ;;  %s588_s4 = smov (!%p138_p2), 1   ;;  %s590_s9 = smov (!%p138_p2), 127   ;;  %v591_v16 = vmov (!%p138_p2), 8   ;;  %v593_v17 = vmov (!%p138_p2), 7  }
   0x9   : > { %v268_v12 = vld [vmem:[%s764_s1] sm:$0xf] (!%p138_p2)  ;;  %s592_s10 = smov (!%p138_p2), 113   ;;  %s594_s17 = smov (!%p138_p2), 111   ;;  %v678_v33 = vand.u32 (!%p138_p2), 127, %v178_v30  ;;  %v186_v34 = vshrl.u32 (!%p138_p2), %v178_v30, 7 }
   0xa   : > { %v319_v13 = vld [vmem:[%s764_s1] sm:$0xf] (!%p138_p2)  ;;  %s595_s18 = smov (!%p138_p2), 112   ;;  %v596_v36 = vmov (!%p138_p2), 839922192   ;;  %vm447_vm8 = vcmask (!%p138_p2), 1043456  }
   0xb   : > { %564 = vset.pattern.permute.xlu1 (!%p138_p2), %v581_v6  ;;  %562 = vset.pattern.permute.xlu0 (!%p138_p2), %v582_v7  ;;  %v351_v15 = vld [vmem:[%s764_s1] sm:$0xf] (!%p138_p2)  ;;  %v306_v37 = vunpack.c.l.s4 (!%p138_p2), %v596_v36  ;;  %v683_v39 = vsub.s32 (!%p138_p2), 0, %v186_v34  ;;  %v685_v40 = vsub.s32 (!%p138_p2), 1, %v186_v34  ;;  %vm209_vm0 = vcmp.lt.s32.totalorder (!%p138_p2), %v678_v33, 16 }
   0xc   : > { %303 = vperm.xlu1 (!%p138_p2), %564, %v300_v4   ;;  %229 = vperm.xlu0 (!%p138_p2), %562, %v204_v5   ;;  %v383_v18 = vld [vmem:[%s764_s1] sm:$0xf] (!%p138_p2)  ;;  %vm180_vm1 = vcmp.lt.s32.totalorder (!%p138_p2), %v678_v33, 17  ;;  %vm241_vm2 = vcmp.lt.s32.totalorder (!%p138_p2), %v678_v33, 15  ;;  %vm273_vm3 = vcmp.lt.s32.totalorder (!%p138_p2), %v678_v33, 1  ;;  %vm324_vm4 = vcmp.lt.s32.totalorder (!%p138_p2), %v678_v33, 127 }
   0xd   : > { %s768_s13 = smov (!%p160_p3, %s517_s13), 1  ;;  %v415_v19 = vld [vmem:[%s764_s1] sm:$0xf]  ;;  %v307_v47 = vunpack.c.0.s8 %v306_v37  ;;  %vm356_vm5 = vcmp.lt.s32.totalorder %v678_v33, 113  ;;  %vm388_vm6 = vcmp.lt.s32.totalorder %v678_v33, 112  ;;  %vm420_vm7 = vcmp.lt.s32.totalorder %v678_v33, 111 }
   0xe   : > { %s534_s22 = sshll.u32 %s768_s13, 3  ;;  %v525_v38 = vld [vmem:[%s765_s2 + $0x1] ss:$8 sm:$0x3]  ;;  %s524_s8 = sshll.u32 %s768_s13, 2  ;;  %vm460_vm9 = vcmask 7168  }
   0xf   : > { %s164_s25 = scalar_lea.vmem %s763_s0, %s534_s22  ;;  %v183_v41 = vld [vmem:[%s765_s2] ss:$8 sm:$0x3]  ;;  %v526_v42 = vld [vmem:[%s765_s2 + $0x2] ss:$8 sm:$0x3]  ;;  %v218_v43 = vrot.slane %v525_v38, %v683_v39  ;;  %v222_v44 = vrot.slane %v525_v38, %v685_v40  ;;  %v310_v62 = vsub.s32 %v307_v47, %v186_v34  ;;  %s168_s11 = scalar_lea.vmem %s766_s3, %s524_s8 }
  0x10   : > { %v643_v8 = vld [vmem:[%s164_s25] sm:$0xff]  ;;  %565 = vset.pattern.permute.xlu1 %v584_v10  ;;  %566 = vset.pattern.permute.xlu0 %v585_v11  ;;  %v188_v50 = vrot.slane %v183_v41, %v683_v39  ;;  %v192_v51 = vrot.slane %v183_v41, %v685_v40  ;;  %v250_v52 = vrot.slane %v526_v42, %v683_v39  ;;  %vm462_vm10 = vcmask 11264  }
  0x11   : > { %v172_v9 = vcombine.high %v643_v8, %v643_v8  ;;  %174 = vrot.lane.b32.xlu1 %v643_v8, %s583_s26  ;;  %v527_v53 = vld [vmem:[%s765_s2 + $0x3] ss:$8 sm:$0x3]  ;;  %v254_v56 = vrot.slane %v526_v42, %v685_v40  ;;  %v528_v11 = vld [vmem:[%s765_s2 + $0x5] ss:$8 sm:$0x3] }
  0x12   : > { %v282_v63 = vrot.slane %v527_v53, %v683_v39  ;;  %v286_v0 = vrot.slane %v527_v53, %v685_v40  ;;  %v530_v42 = vld [vmem:[%s765_s2 + $0x7] ss:$8 sm:$0x3] }
  0x13   : > { %176 = vrot.lane.b32.xlu0 %v172_v9, %s583_s26  ;;  %v401_v53 = vrot.slane %v530_v42, %v685_v40 }
  0x15   : > { %205 = vrot.lane.b32.xlu1 %v643_v8, %s586_s27 }
  0x17   : > { %207 = vrot.lane.b32.xlu0 %v172_v9, %s586_s27 }
  0x19   : > { %293 = vperm.xlu1 %565, %v268_v12  }
  0x1b   : > { %237 = vrot.lane.b32.xlu0 %v643_v8, %s587_s30 }
  0x1d   : > { %239 = vrot.lane.b32.xlu1 %v172_v9, %s587_s30 }
  0x1e   : > { %567 = vset.pattern.permute.xlu1 %v589_v14 }
  0x1f   : > { %269 = vrot.lane.b32.xlu0 %v643_v8, %s588_s4 }
  0x21   : > { %271 = vrot.lane.b32.xlu1 %v172_v9, %s588_s4 }
  0x23   : > { %344 = vperm.xlu0 %566, %v319_v13  }
  0x25   : > { %376 = vperm.xlu1 %567, %v351_v15  }
  0x27   : > { %322 = vrot.lane.b32.xlu0 %v172_v9, %s590_s9 }
  0x28   : > { %569 = vset.pattern.permute.xlu0 %v591_v16 }
  0x29   : > { %320 = vrot.lane.b32.xlu1 %v643_v8, %s590_s9 }
  0x2a   : > { %568 = vset.pattern.permute.xlu1 %v593_v17 }
  0x2b   : > { %352 = vrot.lane.b32.xlu0 %v643_v8, %s592_s10 }
  0x2d   : > { %408 = vperm.xlu1 %568, %v383_v18  }
  0x2f   : > { %440 = vperm.xlu0 %569, %v415_v19  }
  0x31   : > { %354 = vrot.lane.b32.xlu1 %v172_v9, %s592_s10 }
  0x33   : > { %416 = vrot.lane.b32.xlu0 %v643_v8, %s594_s17 }
  0x35   : > { %384 = vrot.lane.b32.xlu1 %v643_v8, %s595_s18 }
  0x39   : > { %386 = vrot.lane.b32.xlu1 %v172_v9, %s595_s18 }
  0x3d   : > { %418 = vrot.lane.b32.xlu1 %v172_v9, %s594_s17 }
  0x86   : > { %v670_v20 = vpop.permute.xlu1 %261  ;;  %v672_v21 = vpop.permute.xlu0 %199 }
  0x8b   : > { %v674_v22 = vpop.permute.xlu1 %303  ;;  %v230_v23 = vpop.permute.xlu0 %229 }
  0x8c   : > { %v311_v15 = vrot.slane %v674_v22, %v310_v62  ;;  %v337_v22 = vrot.slane %v528_v11, %v685_v40 }
  0x8f   : > { %v175_v24 = vpop.permute.xlu1 %174  ;;  %v177_v25 = vpop.permute.xlu0 %176 }
  0x90   : > { %v181_v54 = vsel %vm180_vm1, %v175_v24, %v177_v25  ;;  %v182_v55 = vsel %vm180_vm1, %v177_v25, %v175_v24  ;;  %v529_v24 = vld [vmem:[%s765_s2 + $0x6] ss:$8 sm:$0x3] }
  0x91   : > { %v195_v1 = vmul.f32 %v188_v50, %v182_v55  ;;  %v196_v2 = vmul.f32 %v192_v51, %v181_v54  ;;  %v365_v34 = vrot.slane %v529_v24, %v683_v39 }
  0x93   : > { %v206_v26 = vpop.permute.xlu1 %205  ;;  %v208_v27 = vpop.permute.xlu0 %207  ;;  %v202_v16 = vmul.f32 %v672_v21, %v195_v1  ;;  %v203_v17 = vmul.f32 %v672_v21, %v196_v2 }
  0x94   : > { %v210_v48 = vsel %vm209_vm0, %v206_v26, %v208_v27  ;;  %v211_v49 = vsel %vm209_vm0, %v208_v27, %v206_v26 }
  0x95   : > { %v225_v57 = vmul.f32 %v218_v43, %v211_v49  ;;  %v226_v58 = vmul.f32 %v222_v44, %v210_v48 }
  0x97   : > { %v238_v29 = vpop.permute.xlu0 %237  ;;  %v232_v9 = vmul.f32 %v230_v23, %v225_v57  ;;  %v233_v10 = vmul.f32 %v230_v23, %v226_v58  ;;  %v333_v23 = vrot.slane %v528_v11, %v683_v39 }
  0x98   : > { %v676_v28 = vpop.permute.xlu1 %293 }
  0x99   : > { %v234_v25 = vadd.f32 %v232_v9, %v202_v16  ;;  %v235_v26 = vadd.f32 %v233_v10, %v203_v17 }
  0x9b   : > { %v270_v32 = vpop.permute.xlu0 %269 }
  0x9c   : > { %v240_v31 = vpop.permute.xlu1 %239 }
  0x9d   : > { %v242_v59 = vsel %vm241_vm2, %v238_v29, %v240_v31  ;;  %v243_v60 = vsel %vm241_vm2, %v240_v31, %v238_v29 }
  0x9e   : > { %v257_v6 = vmul.f32 %v250_v52, %v243_v60  ;;  %v258_v7 = vmul.f32 %v254_v56, %v242_v59  ;;  %v397_v52 = vrot.slane %v530_v42, %v683_v39 }
  0xa0   : > { %v272_v35 = vpop.permute.xlu1 %271  ;;  %v264_v18 = vmul.f32 %v670_v20, %v257_v6  ;;  %v265_v19 = vmul.f32 %v670_v20, %v258_v7 }
  0xa1   : > { %v274_v3 = vsel %vm273_vm3, %v270_v32, %v272_v35  ;;  %v275_v4 = vsel %vm273_vm3, %v272_v35, %v270_v32  ;;  %v313_v32 = vmul.f32 %v311_v15, %v643_v8  ;;  %v369_v35 = vrot.slane %v529_v24, %v685_v40  ;;  %v531_v8 = vld [vmem:[%s765_s2 + $0x10] ss:$8 sm:$0x3] }
  0xa2   : > { %v697_v45 = vpop.permute.xlu0 %344  ;;  %v289_v13 = vmul.f32 %v282_v63, %v275_v4  ;;  %v290_v14 = vmul.f32 %v286_v0, %v274_v3  ;;  %v266_v36 = vadd.f32 %v264_v18, %v234_v25  ;;  %v267_v37 = vadd.f32 %v265_v19, %v235_v26 }
  0xa3   : > { %v315_v54 = vcombine.high %v313_v32, %v313_v32  ;;  %v429_v58 = vrot.slane %v531_v8, %v683_v39  ;;  %v433_v59 = vrot.slane %v531_v8, %v685_v40 }
  0xa4   : > { %v699_v46 = vpop.permute.xlu1 %376  ;;  %v296_v29 = vmul.f32 %v676_v28, %v289_v13  ;;  %v297_v30 = vmul.f32 %v676_v28, %v290_v14 }
  0xa6   : > { %v323_v5 = vpop.permute.xlu0 %322  ;;  %v298_v48 = vadd.f32 %v296_v29, %v266_v36  ;;  %v299_v49 = vadd.f32 %v297_v30, %v267_v37 }
  0xa8   : > { %v321_v61 = vpop.permute.xlu1 %320  ;;  %v317_v60 = vadd.f32 %v313_v32, %v298_v48 }
  0xa9   : > { %v325_v31 = vsel %vm324_vm4, %v321_v61, %v323_v5  ;;  %v326_v20 = vsel %vm324_vm4, %v323_v5, %v321_v61  ;;  %v318_v61 = vadd.f32 %v315_v54, %v299_v49 }
  0xaa   : > { %v353_v27 = vpop.permute.xlu0 %352  ;;  %v340_v43 = vmul.f32 %v333_v23, %v325_v31  ;;  %v341_v44 = vmul.f32 %v337_v22, %v326_v20 }
  0xac   : > { %v409_v12 = vpop.permute.xlu1 %408  ;;  %v347_v55 = vmul.f32 %v697_v45, %v340_v43  ;;  %v348_v56 = vmul.f32 %v697_v45, %v341_v44 }
  0xae   : > { %v441_v28 = vpop.permute.xlu0 %440  ;;  %v349_v4 = vadd.f32 %v347_v55, %v317_v60  ;;  %v350_v5 = vadd.f32 %v348_v56, %v318_v61 }
  0xb0   : > { %v355_v21 = vpop.permute.xlu1 %354 }
  0xb1   : > { %v357_v38 = vsel %vm356_vm5, %v353_v27, %v355_v21  ;;  %v358_v41 = vsel %vm356_vm5, %v355_v21, %v353_v27 }
  0xb2   : > { %v372_v50 = vmul.f32 %v365_v34, %v357_v38  ;;  %v373_v51 = vmul.f32 %v369_v35, %v358_v41  ;;  %v417_v45 = vpop.permute.xlu0 %416 }
  0xb4   : > { %v385_v47 = vpop.permute.xlu1 %384  ;;  %v379_v0 = vmul.f32 %v699_v46, %v372_v50  ;;  %v380_v1 = vmul.f32 %v699_v46, %v373_v51 }
  0xb6   : > { %v381_v10 = vadd.f32 %v379_v0, %v349_v4  ;;  %v382_v11 = vadd.f32 %v380_v1, %v350_v5 }
  0xb8   : > { %v387_v57 = vpop.permute.xlu1 %386 }
  0xb9   : > { %v389_v62 = vsel %vm388_vm6, %v385_v47, %v387_v57  ;;  %v390_v63 = vsel %vm388_vm6, %v387_v57, %v385_v47 }
  0xba   : > { %v404_v2 = vmul.f32 %v397_v52, %v389_v62  ;;  %v405_v3 = vmul.f32 %v401_v53, %v390_v63 }
  0xbc   : > { %v411_v39 = vmul.f32 %v409_v12, %v404_v2  ;;  %v412_v6 = vmul.f32 %v409_v12, %v405_v3  ;;  %v419_v40 = vpop.permute.xlu1 %418 }
  0xbd   : > { %v421_v7 = vsel %vm420_vm7, %v417_v45, %v419_v40  ;;  %v422_v9 = vsel %vm420_vm7, %v419_v40, %v417_v45 }
  0xbe   : > { %v436_v13 = vmul.f32 %v429_v58, %v421_v7  ;;  %v437_v14 = vmul.f32 %v433_v59, %v422_v9  ;;  %v413_v16 = vadd.f32 %v411_v39, %v381_v10  ;;  %v414_v17 = vadd.f32 %v412_v6, %v382_v11 }
  0xc0   : > { %v443_v15 = vmul.f32 %v441_v28, %v436_v13  ;;  %v444_v46 = vmul.f32 %v441_v28, %v437_v14 }
  0xc2   : > { %v445_v18 = vadd.f32 %v443_v15, %v413_v16  ;;  %v446_v19 = vadd.f32 %v444_v46, %v414_v17 }
  0xc4   : > { %v448_v12 = vsel %vm447_vm8, %v445_v18, 0.0  ;;  %v449_v23 = vsel %vm447_vm8, %v446_v19, 0.0  ;;  %v453_v24 = vmul.f32 %v445_v18, %v445_v18  ;;  %v454_v25 = vmul.f32 %v446_v19, %v446_v19 }
  0xc5   : > { %v450_v26 = vadd.f32 %v449_v23, %v448_v12 }
  0xc6   : > { %v455_v22 = vsel %vm447_vm8, %v453_v24, 0.0  ;;  %v456_v33 = vsel %vm447_vm8, %v454_v25, 0.0 }
  0xc7   : > { %451 = vadd.xlane.f32.xlu0 %v450_v26  ;;  %v457_v27 = vadd.f32 %v456_v33, %v455_v22 }
  0xc9   : > { %458 = vadd.xlane.f32.xlu1 %v457_v27 }
 0x154   : > { %v452_v21 = vpop.xlane.xlu0 %451 }
 0x156   : > { %v459_v29 = vpop.xlane.xlu1 %458 }
 0x157   : > { %v461_v30 = vsel %vm460_vm9, %v452_v21, %v459_v29 }
 0x158   : > { %463 = vst.msk [vmem:[%s168_s11] sm:$0xf] %vm462_vm10, %v461_v30 }
 0x159 PF: > { %s13_s12 = sadd.s32 1, %s577_s12  }
 0x15a   : > { %p10_p4 = scmp.ge.s32.totalorder %s13_s12, 4  }
 0x15c   :  { %12 = sbr.rel (!%p10_p4) target bundleno = 1 (0x1), region = 69 }

// kernel: depthwise_separable_forward.4
= control target key start
LH: loop header
LB: loop body
LE: loop exit
PB: predicated region body
PF: predicated region fallthrough
CT: control target
= control target key end

     0   :  { %s899_s24 = smov 0   ;;  %s1061_s0 = inlined_call_operand.vmem [shape: f32[2,4,256], index: 0, kind: input, shape index: {}]   ;;  %s1062_s1 = inlined_call_operand.vmem [shape: f32[4,9], index: 1, kind: input, shape index: {}]   ;;  %s1063_s2 = inlined_call_operand.vmem [shape: f32[9,256], index: 2, kind: input, shape index: {}]   ;;  %s1064_s3 = inlined_call_operand.vmem [shape: f32[8,4], index: 3, kind: input, shape index: {}]   ;;  %s1065_s4 = inlined_call_operand.vmem [shape: f32[4,1], index: 4, kind: input, shape index: {}]   ;;  %s1066_s5 = inlined_call_operand.vmem [shape: f32[4,1], index: 5, kind: input, shape index: {}]   ;;  %s1067_s6 = inlined_call_operand.vmem [shape: f32[2,8,256], index: 6, kind: output, shape index: {0}]   ;;  %s1068_s7 = inlined_call_operand.vmem [shape: f32[2,8,2], index: 7, kind: output, shape index: {1}]  }
   0x1 LB: > { %s769_s25 = sadd.s32 4294967295, %s838_s24   ;;  %p773_p0 = scmp.ge.s32.totalorder %s838_s24, 1  ;;  %s838_s24 = sphi %s899_s24, %s18_s24  }
   0x2   : > { %p240_p1 = scmp.lt.s32.totalorder %s838_s24, 3 }
   0x4   : > { %p241_p2 = pnand %p773_p0, %p240_p1 }
   0x5   : > { %v357_v0 = vld [vmem:[%s1062_s1] sm:$0xf] (!%p241_p2)  ;;  %v840_v2 = vmov (!%p241_p2), 2   ;;  %v841_v3 = vmov (!%p241_p2), 0   ;;  %p276_p3 = scmp.lt.s32.totalorder (!%p241_p2), %s769_s25, 1  ;;  %v842_v6 = vmov (!%p241_p2), 4   ;;  %v299_v33 = vlaneseq (!%p241_p2) }
   0x6   : > { %244 = sbr.rel (%p241_p2) target bundleno = 565 (0x235), region = 44  ;;  %v291_v1 = vld [vmem:[%s1062_s1] sm:$0xf] (!%p241_p2)  ;;  %822 = vset.pattern.permute.xlu1 (!%p241_p2), %v840_v2  ;;  %820 = vset.pattern.permute.xlu0 (!%p241_p2), %v841_v3  ;;  %v843_v7 = vmov (!%p241_p2), 1   ;;  %s844_s15 = smov (!%p241_p2), 17   ;;  %v845_v10 = vmov (!%p241_p2), 3  }
   0x7   : > { %382 = vperm.xlu1 (!%p241_p2), %822, %v357_v0   ;;  %320 = vperm.xlu0 (!%p241_p2), %820, %v291_v1   ;;  %v421_v4 = vld [vmem:[%s1062_s1] sm:$0xf] (!%p241_p2)  ;;  %v846_v11 = vmov (!%p241_p2), 5   ;;  %s847_s16 = smov (!%p241_p2), 16   ;;  %s848_s19 = smov (!%p241_p2), 15   ;;  %v850_v14 = vmov (!%p241_p2), 6  }
   0x8   : > { %v325_v5 = vld [vmem:[%s1062_s1] sm:$0xf] (!%p241_p2)  ;;  %s849_s20 = smov (!%p241_p2), 1   ;;  %s851_s27 = smov (!%p241_p2), 127   ;;  %v852_v16 = vmov (!%p241_p2), 8   ;;  %v854_v17 = vmov (!%p241_p2), 7  }
   0x9   : > { %v389_v12 = vld [vmem:[%s1062_s1] sm:$0xf] (!%p241_p2)  ;;  %s853_s28 = smov (!%p241_p2), 113   ;;  %s855_s10 = smov (!%p241_p2), 111   ;;  %v857_v22 = vmov (!%p241_p2), 0.0   ;;  %v968_v35 = vand.u32 (!%p241_p2), 127, %v299_v33 }
   0xa   : > { %v440_v13 = vld [vmem:[%s1062_s1] sm:$0xf] (!%p241_p2)  ;;  %662 = vmatprep.mubr.f32.mxu0 (!%p241_p2), %v857_v22  ;;  %v307_v36 = vshrl.u32 (!%p241_p2), %v299_v33, 7  ;;  %v858_v39 = vmov (!%p241_p2), 839922192   ;;  %vm591_vm8 = vcmask (!%p241_p2), 1043456  }
   0xb   : > { %823 = vset.pattern.permute.xlu1 (!%p241_p2), %v842_v6  ;;  %821 = vset.pattern.permute.xlu0 (!%p241_p2), %v843_v7  ;;  %v472_v15 = vld [vmem:[%s1062_s1] sm:$0xf] (!%p241_p2)  ;;  %v427_v40 = vunpack.c.l.s4 (!%p241_p2), %v858_v39  ;;  %vm330_vm0 = vcmp.lt.s32.totalorder (!%p241_p2), %v968_v35, 16  ;;  %vm301_vm1 = vcmp.lt.s32.totalorder (!%p241_p2), %v968_v35, 17  ;;  %vm362_vm2 = vcmp.lt.s32.totalorder (!%p241_p2), %v968_v35, 15 }
   0xc   : > { %424 = vperm.xlu1 (!%p241_p2), %823, %v421_v4   ;;  %350 = vperm.xlu0 (!%p241_p2), %821, %v325_v5   ;;  %v504_v18 = vld [vmem:[%s1062_s1] sm:$0xf] (!%p241_p2)  ;;  %v973_v42 = vsub.s32 (!%p241_p2), 0, %v307_v36  ;;  %v975_v43 = vsub.s32 (!%p241_p2), 1, %v307_v36  ;;  %vm394_vm3 = vcmp.lt.s32.totalorder (!%p241_p2), %v968_v35, 1  ;;  %vm445_vm4 = vcmp.lt.s32.totalorder (!%p241_p2), %v968_v35, 127 }
   0xd   : > { %s1070_s25 = smov (!%p276_p3, %s769_s25), 1  ;;  %v536_v19 = vld [vmem:[%s1062_s1] sm:$0xf]  ;;  %v428_v49 = vunpack.c.0.s8 %v427_v40  ;;  %vm477_vm5 = vcmp.lt.s32.totalorder %v968_v35, 113  ;;  %vm509_vm6 = vcmp.lt.s32.totalorder %v968_v35, 112  ;;  %vm541_vm7 = vcmp.lt.s32.totalorder %v968_v35, 111 }
   0xe   : > { %s791_s11 = sshll.u32 %s1070_s25, 3  ;;  %v568_v20 = vld [vmem:[%s1065_s4] sm:$0xf]  ;;  %vm587_vm9 = vcmask 31744   ;;  %vm679_vm10 = vcmask 7168   ;;  %vm681_vm11 = vcmask 15360  }
   0xf   : > { %s280_s14 = scalar_lea.vmem %s1061_s0, %s791_s11  ;;  %v576_v21 = vld [vmem:[%s1066_s5] sm:$0xf]  ;;  %v431_v1 = vsub.s32 %v428_v49, %v307_v36  ;;  %s289_s21 = scalar_lea.vmem %s1068_s7, %s791_s11 }
  0x10   : > { %v927_v8 = vld [vmem:[%s280_s14] sm:$0xff]  ;;  %824 = vset.pattern.permute.xlu1 %v845_v10  ;;  %825 = vset.pattern.permute.xlu0 %v846_v11  ;;  %s856_s14 = smov 112  }
  0x11   : > { %v293_v9 = vcombine.high %v927_v8, %v927_v8  ;;  %295 = vrot.lane.b32.xlu1 %v927_v8, %s844_s15  ;;  %v779_v41 = vld [vmem:[%s1063_s2 + $0x1] ss:$8 sm:$0x3]  ;;  %v304_v44 = vld [vmem:[%s1063_s2] ss:$8 sm:$0x3] }
  0x12   : > { %v780_v45 = vld [vmem:[%s1063_s2 + $0x2] ss:$8 sm:$0x3]  ;;  %v339_v46 = vrot.slane %v779_v41, %v973_v42  ;;  %v343_v47 = vrot.slane %v779_v41, %v975_v43  ;;  %v309_v52 = vrot.slane %v304_v44, %v973_v42  ;;  %v313_v53 = vrot.slane %v304_v44, %v975_v43  ;;  %v781_v55 = vld [vmem:[%s1063_s2 + $0x3] ss:$8 sm:$0x3] }
  0x13   : > { %297 = vrot.lane.b32.xlu0 %v293_v9, %s844_s15  ;;  %v371_v54 = vrot.slane %v780_v45, %v973_v42  ;;  %v375_v59 = vrot.slane %v780_v45, %v975_v43  ;;  %v403_v2 = vrot.slane %v781_v55, %v973_v42  ;;  %v784_v45 = vld [vmem:[%s1063_s2 + $0x7] ss:$8 sm:$0x3]  ;;  %s792_s15 = sshll.u32 %s1070_s25, 4 }
  0x14   : > { %s285_s18 = scalar_lea.vmem %s1067_s6, %s792_s15 }
  0x15   : > { %326 = vrot.lane.b32.xlu1 %v927_v8, %s847_s16 }
  0x17   : > { %328 = vrot.lane.b32.xlu0 %v293_v9, %s847_s16 }
  0x19   : > { %414 = vperm.xlu1 %824, %v389_v12  }
  0x1b   : > { %358 = vrot.lane.b32.xlu0 %v927_v8, %s848_s19 }
  0x1d   : > { %360 = vrot.lane.b32.xlu1 %v293_v9, %s848_s19 }
  0x1e   : > { %826 = vset.pattern.permute.xlu1 %v850_v14  ;;  %v782_v14 = vld [vmem:[%s1063_s2 + $0x5] ss:$8 sm:$0x3] }
  0x1f   : > { %390 = vrot.lane.b32.xlu0 %v927_v8, %s849_s20 }
  0x21   : > { %392 = vrot.lane.b32.xlu1 %v293_v9, %s849_s20 }
  0x23   : > { %465 = vperm.xlu0 %825, %v440_v13  }
  0x25   : > { %497 = vperm.xlu1 %826, %v472_v15  }
  0x27   : > { %443 = vrot.lane.b32.xlu0 %v293_v9, %s851_s27 }
  0x28   : > { %828 = vset.pattern.permute.xlu0 %v852_v16 }
  0x29   : > { %441 = vrot.lane.b32.xlu1 %v927_v8, %s851_s27 }
  0x2a   : > { %827 = vset.pattern.permute.xlu1 %v854_v17 }
  0x2b   : > { %473 = vrot.lane.b32.xlu0 %v927_v8, %s853_s28 }
  0x2d   : > { %529 = vperm.xlu1 %827, %v504_v18  }
  0x2f   : > { %561 = vperm.xlu0 %828, %v536_v19  }
  0x31   : > { %475 = vrot.lane.b32.xlu1 %v293_v9, %s853_s28 }
  0x32   : > { %830 = vset.pattern.permute.xlu1 %v841_v3 }
  0x33   : > { %537 = vrot.lane.b32.xlu0 %v927_v8, %s855_s10 }
  0x34   : > { %829 = vset.pattern.permute.xlu0 %v841_v3  ;;  %v407_v3 = vrot.slane %v781_v55, %v975_v43  ;;  %v522_v55 = vrot.slane %v784_v45, %v975_v43 }
  0x35   : > { %505 = vrot.lane.b32.xlu1 %v927_v8, %s856_s14 }
  0x37   : > { %571 = vperm.xlu0 %829, %v568_v20  }
  0x39   : > { %507 = vrot.lane.b32.xlu1 %v293_v9, %s856_s14 }
  0x3d   : > { %539 = vrot.lane.b32.xlu1 %v293_v9, %s855_s10 }
  0x41   : > { %579 = vperm.xlu1 %830, %v576_v21  }
  0x86   : > { %v960_v23 = vpop.permute.xlu1 %382  ;;  %v962_v24 = vpop.permute.xlu0 %320 }
  0x8b   : > { %v964_v25 = vpop.permute.xlu1 %424  ;;  %v351_v26 = vpop.permute.xlu0 %350 }
  0x8c   : > { %v432_v18 = vrot.slane %v964_v25, %v431_v1  ;;  %v458_v25 = vrot.slane %v782_v14, %v975_v43 }
  0x8f   : > { %v296_v27 = vpop.permute.xlu1 %295  ;;  %v298_v28 = vpop.permute.xlu0 %297 }
  0x90   : > { %v302_v57 = vsel %vm301_vm1, %v296_v27, %v298_v28  ;;  %v303_v58 = vsel %vm301_vm1, %v298_v28, %v296_v27  ;;  %v783_v27 = vld [vmem:[%s1063_s2 + $0x6] ss:$8 sm:$0x3] }
  0x91   : > { %v316_v4 = vmul.f32 %v309_v52, %v303_v58  ;;  %v317_v5 = vmul.f32 %v313_v53, %v302_v57 }
  0x93   : > { %v327_v29 = vpop.permute.xlu1 %326  ;;  %v329_v30 = vpop.permute.xlu0 %328  ;;  %v323_v19 = vmul.f32 %v962_v24, %v316_v4  ;;  %v324_v20 = vmul.f32 %v962_v24, %v317_v5 }
  0x94   : > { %v331_v50 = vsel %vm330_vm0, %v327_v29, %v329_v30  ;;  %v332_v51 = vsel %vm330_vm0, %v329_v30, %v327_v29 }
  0x95   : > { %v346_v60 = vmul.f32 %v339_v46, %v332_v51  ;;  %v347_v61 = vmul.f32 %v343_v47, %v331_v50 }
  0x97   : > { %v359_v32 = vpop.permute.xlu0 %358  ;;  %v353_v11 = vmul.f32 %v351_v26, %v346_v60  ;;  %v354_v12 = vmul.f32 %v351_v26, %v347_v61  ;;  %v454_v26 = vrot.slane %v782_v14, %v973_v42 }
  0x98   : > { %v966_v31 = vpop.permute.xlu1 %414 }
  0x99   : > { %v355_v28 = vadd.f32 %v353_v11, %v323_v19  ;;  %v356_v29 = vadd.f32 %v354_v12, %v324_v20 }
  0x9b   : > { %v391_v37 = vpop.permute.xlu0 %390 }
  0x9c   : > { %v361_v34 = vpop.permute.xlu1 %360 }
  0x9d   : > { %v363_v62 = vsel %vm362_vm2, %v359_v32, %v361_v34  ;;  %v364_v63 = vsel %vm362_vm2, %v361_v34, %v359_v32 }
  0x9e   : > { %v378_v9 = vmul.f32 %v371_v54, %v364_v63  ;;  %v379_v10 = vmul.f32 %v375_v59, %v363_v62  ;;  %v518_v54 = vrot.slane %v784_v45, %v973_v42 }
  0xa0   : > { %v393_v38 = vpop.permute.xlu1 %392  ;;  %v385_v21 = vmul.f32 %v960_v23, %v378_v9  ;;  %v386_v22 = vmul.f32 %v960_v23, %v379_v10  ;;  %v434_v23 = vmul.f32 %v432_v18, %v927_v8  ;;  %v785_v8 = vld [vmem:[%s1063_s2 + $0x10] ss:$8 sm:$0x3] }
  0xa1   : > { %v395_v6 = vsel %vm394_vm3, %v391_v37, %v393_v38  ;;  %v396_v7 = vsel %vm394_vm3, %v393_v38, %v391_v37  ;;  %v486_v37 = vrot.slane %v783_v27, %v973_v42  ;;  %v490_v38 = vrot.slane %v783_v27, %v975_v43 }
  0xa2   : > { %v996_v56 = vpop.permute.xlu0 %465  ;;  %v410_v16 = vmul.f32 %v403_v2, %v396_v7  ;;  %v411_v17 = vmul.f32 %v407_v3, %v395_v6  ;;  %v387_v39 = vadd.f32 %v385_v21, %v355_v28  ;;  %v388_v40 = vadd.f32 %v386_v22, %v356_v29 }
  0xa3   : > { %v436_v57 = vcombine.high %v434_v23, %v434_v23  ;;  %v550_v61 = vrot.slane %v785_v8, %v973_v42  ;;  %v554_v62 = vrot.slane %v785_v8, %v975_v43 }
  0xa4   : > { %v987_v48 = vpop.permute.xlu1 %497  ;;  %v417_v24 = vmul.f32 %v966_v31, %v410_v16  ;;  %v418_v32 = vmul.f32 %v966_v31, %v411_v17 }
  0xa6   : > { %v444_v13 = vpop.permute.xlu0 %443  ;;  %v419_v49 = vadd.f32 %v417_v24, %v387_v39  ;;  %v420_v50 = vadd.f32 %v418_v32, %v388_v40  ;;  %v586_v24 = vld [vmem:[%s1064_s3] sm:$0xff] }
  0xa8   : > { %v442_v0 = vpop.permute.xlu1 %441  ;;  %v438_v63 = vadd.f32 %v434_v23, %v419_v49 }
  0xa9   : > { %v446_v33 = vsel %vm445_vm4, %v442_v0, %v444_v13  ;;  %v447_v34 = vsel %vm445_vm4, %v444_v13, %v442_v0  ;;  %v439_v0 = vadd.f32 %v436_v57, %v420_v50 }
  0xaa   : > { %v474_v36 = vpop.permute.xlu0 %473  ;;  %v461_v46 = vmul.f32 %v454_v26, %v446_v33  ;;  %v462_v47 = vmul.f32 %v458_v25, %v447_v34 }
  0xac   : > { %v530_v15 = vpop.permute.xlu1 %529  ;;  %v468_v58 = vmul.f32 %v996_v56, %v461_v46  ;;  %v469_v59 = vmul.f32 %v996_v56, %v462_v47 }
  0xae   : > { %v562_v51 = vpop.permute.xlu0 %561  ;;  %v470_v56 = vadd.f32 %v468_v58, %v438_v63  ;;  %v471_v7 = vadd.f32 %v469_v59, %v439_v0 }
  0xb0   : > { %v476_v30 = vpop.permute.xlu1 %475 }
  0xb1   : > { %v478_v41 = vsel %vm477_vm5, %v474_v36, %v476_v30  ;;  %v479_v44 = vsel %vm477_vm5, %v476_v30, %v474_v36 }
  0xb2   : > { %v493_v52 = vmul.f32 %v486_v37, %v478_v41  ;;  %v494_v53 = vmul.f32 %v490_v38, %v479_v44  ;;  %v538_v9 = vpop.permute.xlu0 %537 }
  0xb4   : > { %v506_v31 = vpop.permute.xlu1 %505  ;;  %v500_v3 = vmul.f32 %v987_v48, %v493_v52  ;;  %v501_v4 = vmul.f32 %v987_v48, %v494_v53 }
  0xb6   : > { %v502_v13 = vadd.f32 %v500_v3, %v470_v56  ;;  %v503_v14 = vadd.f32 %v501_v4, %v471_v7  ;;  %v572_v21 = vpop.permute.xlu0 %571 }
  0xb8   : > { %v508_v60 = vpop.permute.xlu1 %507 }
  0xb9   : > { %v510_v1 = vsel %vm509_vm6, %v506_v31, %v508_v60  ;;  %v511_v2 = vsel %vm509_vm6, %v508_v60, %v506_v31 }
  0xba   : > { %v525_v5 = vmul.f32 %v518_v54, %v510_v1  ;;  %v526_v6 = vmul.f32 %v522_v55, %v511_v2 }
  0xbc   : > { %v532_v42 = vmul.f32 %v530_v15, %v525_v5  ;;  %v533_v10 = vmul.f32 %v530_v15, %v526_v6  ;;  %v540_v43 = vpop.permute.xlu1 %539 }
  0xbd   : > { %v542_v11 = vsel %vm541_vm7, %v538_v9, %v540_v43  ;;  %v543_v12 = vsel %vm541_vm7, %v540_v43, %v538_v9 }
  0xbe   : > { %v557_v16 = vmul.f32 %v550_v61, %v542_v11  ;;  %v558_v17 = vmul.f32 %v554_v62, %v543_v12  ;;  %v534_v19 = vadd.f32 %v532_v42, %v502_v13  ;;  %v535_v20 = vadd.f32 %v533_v10, %v503_v14 }
  0xc0   : > { %v564_v18 = vmul.f32 %v562_v51, %v557_v16  ;;  %v565_v48 = vmul.f32 %v562_v51, %v558_v17  ;;  %v580_v15 = vpop.permute.xlu1 %579 }
  0xc2   : > { %v566_v22 = vadd.f32 %v564_v18, %v534_v19  ;;  %v567_v26 = vadd.f32 %v565_v48, %v535_v20 }
  0xc4   : > { %v574_v27 = vmul.f32 %v572_v21, %v566_v22  ;;  %v575_v28 = vmul.f32 %v572_v21, %v567_v26 }
  0xc6   : > { %v582_v29 = vadd.f32 %v580_v15, %v574_v27  ;;  %v583_v25 = vadd.f32 %v580_v15, %v575_v28 }
  0xc8   : > { %v584_v35 = vmax.f32 %v582_v29, 0.0  ;;  %v585_v30 = vmax.f32 %v583_v25, 0.0 }
  0xca   : > { %786 = vmatprep.subr.msk.mxu0 %vm591_vm8, %v585_v30 }
  0xcb   : > { %787 = vmatpush1.msk.msra.mxu0 %vm591_vm8, %v584_v35 }
  0xcc   : > { %788 = vmatmul.mubr.msk.f32.vlgmr.msra.gmra.mrb[0].mxu0 %vm587_vm9, %v586_v24 }
 0x19f   : > { %v664_v32 = vpop.f32.mrb[0].mxu0 }
 0x1a0   : > { %v666_v33 = vpop.f32.mrb[1].mxu0  ;;  %669 = vst [vmem:[%s285_s18] sm:$0xff] %v664_v32  ;;  %v674_v34 = vmul.f32 %v664_v32, %v664_v32 }
 0x1a1   : > { %670 = vst [vmem:[%s285_s18 + $0x8] sm:$0xff] %v666_v33  ;;  %v675_v23 = vmul.f32 %v666_v33, %v666_v33  ;;  %v671_v36 = vadd.f32 %v666_v33, %v664_v32 }
 0x1a3   : > { %672 = vadd.xlane.f32.xlu1 %v671_v36  ;;  %v676_v37 = vadd.f32 %v675_v23, %v674_v34 }
 0x1a5   : > { %677 = vadd.xlane.f32.xlu0 %v676_v37 }
 0x230   : > { %v673_v38 = vpop.xlane.xlu1 %672 }
 0x232   : > { %v678_v39 = vpop.xlane.xlu0 %677 }
 0x233   : > { %v680_v40 = vsel %vm679_vm10, %v673_v38, %v678_v39 }
 0x234   : > { %682 = vst.msk [vmem:[%s289_s21] sm:$0xff] %vm681_vm11, %v680_v40 }
 0x235 PF: > { %s18_s24 = sadd.s32 1, %s838_s24  }
 0x236   : > { %p15_p4 = scmp.ge.s32.totalorder %s18_s24, 4  }
 0x238   :  { %17 = sbr.rel (!%p15_p4) target bundleno = 1 (0x1), region = 93 }

</bundles_post_ra>
